<compile_context>
chip_gen: v5e
topology: v5e:2x2
jax: 0.10.0
libtpu: 0.0.40
codegen_flags: <defaults>
</compile_context>

<pallas_src>
import functools

import jax
import jax.numpy as jnp
from jax.experimental import pallas as pl
from jax.experimental.pallas import tpu as pltpu

_VMEM_LIMIT = 32 * 1024 * 1024  # fits v5e/v6e and v7x (64 MiB physical) with headroom


def _cparams(dims):
    return pltpu.CompilerParams(dimension_semantics=dims,
                                vmem_limit_bytes=_VMEM_LIMIT)


def _round_up(x, m):
    return ((x + m - 1) // m) * m


def _pick_tm(M):
    for t in (512, 256, 128, 64, 32, 16, 8):
        if M >= t and M % t == 0:
            return t
    return M


def _pick_tk(K, max_tk=1536):
    best = min(K, 128)
    t = 128
    while t <= min(K, max_tk):
        if K % t == 0:
            best = t
        t += 128
    return best


# ----------------------------------------------------------------------------
# Fused conv-as-matmul kernel: bf16 matmul + f32 accumulate + BN bias
#                              (+ residual add) (+ ReLU)
# ----------------------------------------------------------------------------
def _fused_matmul_kernel(a_ref, b_ref, bias_ref, *rest, relu, has_residual):
    if has_residual:
        res_ref, o_ref, acc_ref = rest
    else:
        o_ref, acc_ref = rest
        res_ref = None
    k = pl.program_id(1)

    @pl.when(k == 0)
    def _():
        acc_ref[...] = jnp.zeros_like(acc_ref)

    acc_ref[...] += jnp.dot(a_ref[...], b_ref[...],
                            preferred_element_type=jnp.float32)

    @pl.when(k == pl.num_programs(1) - 1)
    def _():
        out = acc_ref[...] + bias_ref[...]
        if has_residual:
            out = out + res_ref[...].astype(jnp.float32)
        if relu:
            out = jnp.maximum(out, 0.0)
        o_ref[...] = out.astype(o_ref.dtype)


def fused_matmul(a, b, bias, *, residual=None, relu=False,
                 out_dtype=jnp.bfloat16):
    """(M,K)@(K,N) + bias[N] (+ residual[M,N]) (+ ReLU).

    bf16 operands, f32 accumulation.  Grid = (M tiles 'parallel',
    K tiles 'arbitrary'); N (<= 512 here, multiple of 128) is one lane-dense
    block.  K is padded to a multiple of 128 if needed.
    """
    M, K = a.shape
    Kb, N = b.shape
    assert K == Kb
    k_pad = _round_up(K, 128)
    if k_pad != K:
        a = jnp.pad(a, ((0, 0), (0, k_pad - K)))
        b = jnp.pad(b, ((0, k_pad - K), (0, 0)))
        K = k_pad
    a = a.astype(jnp.bfloat16)
    b = b.astype(jnp.bfloat16)
    bias2 = bias.reshape(1, N).astype(jnp.float32)

    tm = _pick_tm(M)
    tk = _pick_tk(K)
    grid = (M // tm, K // tk)

    in_specs = [
        pl.BlockSpec((tm, tk), lambda i, k: (i, k)),
        pl.BlockSpec((tk, N), lambda i, k: (k, 0)),
        pl.BlockSpec((1, N), lambda i, k: (0, 0)),
    ]
    operands = [a, b, bias2]
    has_residual = residual is not None
    if has_residual:
        in_specs.append(pl.BlockSpec((tm, N), lambda i, k: (i, 0)))
        operands.append(residual.astype(jnp.bfloat16))

    return pl.pallas_call(
        functools.partial(_fused_matmul_kernel, relu=relu,
                          has_residual=has_residual),
        out_shape=jax.ShapeDtypeStruct((M, N), out_dtype),
        grid=grid,
        in_specs=in_specs,
        out_specs=pl.BlockSpec((tm, N), lambda i, k: (i, 0)),
        scratch_shapes=[pltpu.VMEM((tm, N), jnp.float32)],
        compiler_params=_cparams(("parallel", "arbitrary")),
    )(*operands)


# ----------------------------------------------------------------------------
# MaxPool / global average pool / ReLU+Linear head kernels
# ----------------------------------------------------------------------------
def _maxpool_kernel(p_ref, o_ref):
    o_ref[...] = jnp.max(p_ref[...], axis=0)


def maxpool2d(x_nhwc, k=3, stride=2, pad=1):
    B, H, W, C = x_nhwc.shape
    neg = float(jnp.finfo(x_nhwc.dtype).min)
    xp = jnp.pad(x_nhwc, ((0, 0), (pad, pad), (pad, pad), (0, 0)),
                 constant_values=neg)
    oh = (H + 2 * pad - k) // stride + 1
    ow = (W + 2 * pad - k) // stride + 1
    cols = [xp[:, i:i + stride * oh:stride, j:j + stride * ow:stride, :]
            for i in range(k) for j in range(k)]
    # Stack on a NEW leading axis -> (k*k, M, C): no HBM-level transpose needed.
    patches = jnp.stack(cols, axis=0).reshape(k * k, B * oh * ow, C)
    M = B * oh * ow
    tm = _pick_tm(M)
    out = pl.pallas_call(
        _maxpool_kernel,
        out_shape=jax.ShapeDtypeStruct((M, C), x_nhwc.dtype),
        grid=(M // tm,),
        in_specs=[pl.BlockSpec((k * k, tm, C), lambda i: (0, i, 0))],
        out_specs=pl.BlockSpec((tm, C), lambda i: (i, 0)),
        compiler_params=_cparams(("parallel",)),
    )(patches)
    return out.reshape(B, oh, ow, C)


def _avgpool_kernel(x_ref, o_ref):
    o_ref[...] = jnp.mean(x_ref[...].astype(jnp.float32), axis=1)


def global_avg_pool(x_bhwc):
    """(B, H, W, C) -> (B, C) f32   (AdaptiveAvgPool2d(1) + squeeze.squeeze)."""
    B, H, W, C = x_bhwc.shape
    x3 = x_bhwc.reshape(B, H * W, C)
    return pl.pallas_call(
        _avgpool_kernel,
        out_shape=jax.ShapeDtypeStruct((B, C), jnp.float32),
        grid=(1,),
        in_specs=[pl.BlockSpec((B, H * W, C), lambda i: (0, 0, 0))],
        out_specs=pl.BlockSpec((B, C), lambda i: (0, 0)),
        compiler_params=_cparams(("arbitrary",)),
    )(x3)


def _relu_linear_kernel(x_ref, w_ref, b_ref, o_ref):
    x = jnp.maximum(x_ref[...], 0.0)  # F.relu before the classifier head
    o_ref[...] = jnp.dot(x, w_ref[...],
                         preferred_element_type=jnp.float32) + b_ref[...]


def relu_linear(x, w, b):
    """x: (B, D) f32; w: (D, n_class); b: (n_class,) -> (B, n_class) f32."""
    B, D = x.shape
    D2, N = w.shape
    assert D == D2
    b2 = b.reshape(1, N).astype(jnp.float32)
    return pl.pallas_call(
        _relu_linear_kernel,
        out_shape=jax.ShapeDtypeStruct((B, N), jnp.float32),
        grid=(1,),
        in_specs=[
            pl.BlockSpec((B, D), lambda i: (0, 0)),
            pl.BlockSpec((D, N), lambda i: (0, 0)),
            pl.BlockSpec((1, N), lambda i: (0, 0)),
        ],
        out_specs=pl.BlockSpec((B, N), lambda i: (0, 0)),
        compiler_params=_cparams(("arbitrary",)),
    )(x.astype(jnp.float32), w.astype(jnp.float32), b2)


# ----------------------------------------------------------------------------
# JAX glue: im2col, conv wrapper
# ----------------------------------------------------------------------------
def _im2col(x_nhwc, kh, kw, stride, pad):
    B, H, W, C = x_nhwc.shape
    xp = jnp.pad(x_nhwc, ((0, 0), (pad, pad), (pad, pad), (0, 0))) if pad > 0 else x_nhwc
    oh = (H + 2 * pad - kh) // stride + 1
    ow = (W + 2 * pad - kw) // stride + 1
    cols = [xp[:, i:i + stride * oh:stride, j:j + stride * ow:stride, :]
            for i in range(kh) for j in range(kw)]
    # (B, oh, ow, kh*kw, C): patch index order i*kw + j, channels fastest
    patches = jnp.stack(cols, axis=3)
    return patches.reshape(B * oh * ow, kh * kw * C), oh, ow


def conv_bn(x_nhwc, fp, *, relu, residual=None):
    """Conv2d + folded inference BatchNorm (+ fused residual add) (+ ReLU)."""
    B, H, W, C = x_nhwc.shape
    assert C == fp["in_c"], (C, fp["in_c"])
    patches, oh, ow = _im2col(x_nhwc, fp["kh"], fp["kw"], fp["stride"], fp["pad"])
    if patches.shape[1] != fp["w2"].shape[0]:  # ragged stem K (147 -> 256)
        patches = jnp.pad(
            patches, ((0, 0), (0, fp["w2"].shape[0] - patches.shape[1])))
    res2 = None
    if residual is not None:
        res2 = residual.reshape(B * oh * ow, fp["out_c"])
    out = fused_matmul(patches, fp["w2"], fp["shift"], residual=res2, relu=relu)
    return out.reshape(B, oh, ow, fp["out_c"])


# ----------------------------------------------------------------------------
# Deterministic synthetic ResNet-18 parameters + inference-time folding
# ----------------------------------------------------------------------------
def _make_conv_bn(key, outc, inc, k):
    k1, k2, k3, k4, k5 = jax.random.split(key, 5)
    fan_in = inc * k * k
    return {
        "w": jax.random.normal(k1, (outc, inc, k, k), jnp.float32) / jnp.sqrt(fan_in),
        "gamma": 0.5 + jax.random.uniform(k2, (outc,), jnp.float32),
        "beta": 0.1 * jax.random.normal(k3, (outc,), jnp.float32),
        "mean": 0.1 * jax.random.normal(k4, (outc,), jnp.float32),
        "var": 0.5 + jax.random.uniform(k5, (outc,), jnp.float32),
    }


def build_params(key, n_class=8):
    keys = iter(jax.random.split(key, 32))
    params = {"conv1": _make_conv_bn(next(keys), 64, 3, 7)}
    layers = []
    in_c = 64
    for out_c, stride in [(64, 1), (128, 2), (256, 2), (512, 2)]:
        blocks = []
        for b in range(2):
            s = stride if b == 0 else 1
            blk_in = in_c if b == 0 else out_c
            blk = {
                "conv1": _make_conv_bn(next(keys), out_c, blk_in, 3),
                "conv2": _make_conv_bn(next(keys), out_c, out_c, 3),
            }
            if b == 0 and (s != 1 or blk_in != out_c):
                blk["down"] = _make_conv_bn(next(keys), out_c, blk_in, 1)
            blocks.append(blk)
        in_c = out_c
        layers.append(blocks)
    params["layers"] = layers
    params["fc_w"] = jax.random.normal(next(keys), (n_class, 512), jnp.float32) / jnp.sqrt(512.0)
    params["fc_b"] = 0.01 * jax.random.normal(next(keys), (n_class,), jnp.float32)
    return params


def _fold_conv_bn(p, *, in_c_pad, stride, pad):
    """Fold BN into the conv weight; pad in/out channels to lane-dense sizes."""
    eps = 1e-5
    outc, inc, kh, kw = p["w"].shape
    outc_pad = _round_up(outc, 128)
    scale = p["gamma"] / jnp.sqrt(p["var"] + eps)      # (outc,)
    shift = p["beta"] - p["mean"] * scale              # (outc,)
    w = p["w"] * scale[:, None, None, None]
    w = jnp.transpose(w, (2, 3, 1, 0))                 # (kh, kw, inc, outc)
    w = jnp.pad(w, ((0, 0), (0, 0),
                    (0, in_c_pad - inc), (0, outc_pad - outc)))
    w2 = w.reshape(kh * kw * in_c_pad, outc_pad)
    k_dim = w2.shape[0]
    k_pad = _round_up(k_dim, 128)
    if k_pad != k_dim:                                  # stem: 147 -> 256
        w2 = jnp.pad(w2, ((0, k_pad - k_dim), (0, 0)))
    shift = jnp.pad(shift, (0, outc_pad - outc))
    return {
        "w2": w2.astype(jnp.bfloat16),
        "shift": shift.astype(jnp.float32),
        "kh": kh, "kw": kw, "stride": stride, "pad": pad,
        "in_c": in_c_pad, "out_c": outc_pad,
    }


def fold_params(params):
    fp = {"conv1": _fold_conv_bn(params["conv1"], in_c_pad=3, stride=2, pad=3)}
    layers = []
    in_c = 64
    for blocks_raw, (out_c, stride) in zip(
            params["layers"], [(64, 1), (128, 2), (256, 2), (512, 2)]):
        blocks = []
        for b, blk_raw in enumerate(blocks_raw):
            s = stride if b == 0 else 1
            blk_in = in_c if b == 0 else out_c
            blk = {
                "conv1": _fold_conv_bn(blk_raw["conv1"],
                                       in_c_pad=_round_up(blk_in, 128),
                                       stride=s, pad=1),
                "conv2": _fold_conv_bn(blk_raw["conv2"],
                                       in_c_pad=_round_up(out_c, 128),
                                       stride=1, pad=1),
            }
            if "down" in blk_raw:
                blk["down"] = _fold_conv_bn(blk_raw["down"],
                                            in_c_pad=_round_up(blk_in, 128),
                                            stride=s, pad=0)
            blocks.append(blk)
        in_c = out_c
        layers.append(blocks)
    fp["layers"] = layers
    fp["fc_w"] = params["fc_w"].astype(jnp.float32)
    fp["fc_b"] = params["fc_b"].astype(jnp.float32)
    return fp


# ----------------------------------------------------------------------------
# SkinModel forward (emb_type='resnet18')
# ----------------------------------------------------------------------------
def _basic_block(x, blk):
    out = conv_bn(x, blk["conv1"], relu=True)
    identity = conv_bn(x, blk["down"], relu=False) if "down" in blk else x
    # Residual add + ReLU fused into conv2's matmul epilogue.
    return conv_bn(out, blk["conv2"], relu=True, residual=identity)


def skin_model_forward(img_nchw, fparams):
    # NCHW (PyTorch) -> NHWC; activations carried as bf16 with lane-dense channels.
    x = jnp.transpose(img_nchw, (0, 2, 3, 1)).astype(jnp.bfloat16)
    x = conv_bn(x, fparams["conv1"], relu=True)      # stem conv7x7/2 + BN + ReLU
    x = maxpool2d(x, k=3, stride=2, pad=1)
    for blocks in fparams["layers"]:                 # 4 stages x 2 basic blocks
        for blk in blocks:
            x = _basic_block(x, blk)
    feat = global_avg_pool(x)                        # (B, 512) f32
    # head: x = F.relu(x); x = self.linear(x)
    logits = relu_linear(feat, fparams["fc_w"].T, fparams["fc_b"])
    return logits


if __name__ == "__main__":
    key = jax.random.PRNGKey(0)
    k_img, k_par = jax.random.split(key)
    img = jax.random.normal(k_img, (2, 3, 64, 64), jnp.float32)   # small NCHW input
    params = build_params(k_par, n_class=8)
    fparams = fold_params(params)

    out = skin_model_forward(img, fparams)
    out = jax.block_until_ready(out)
    assert out.shape == (2, 8) and out.dtype == jnp.float32
    assert bool(jnp.all(jnp.isfinite(out)))
    print("KERNEL_OK")
</pallas_src>

<mosaic_0001>
module attributes {stable_mosaic.version = 11 : i64} {
  func.func @_fused_matmul_kernel(%arg0: i32, %arg1: i32, %arg2: memref<512x256xbf16, #tpu.memory_space<vmem>>, %arg3: memref<256x128xbf16, #tpu.memory_space<vmem>>, %arg4: memref<1x128xf32, #tpu.memory_space<vmem>>, %arg5: memref<512x128xbf16, #tpu.memory_space<vmem>>, %arg6: memref<512x128xf32, #tpu.memory_space<vmem>>) attributes {dimension_semantics = [#tpu.dimension_semantics<parallel>, #tpu.dimension_semantics<arbitrary>], iteration_bounds = array<i64: 4, 1>, scalar_prefetch = 0 : i64, scratch_operands = 1 : i64, tpu.core_type = #tpu.core_type<tc>, window_params = [{transform_indices = @transform_0, window_bounds = array<i64: 512, 256>}, {transform_indices = @transform_1, window_bounds = array<i64: 256, 128>}, {pipeline_mode = #tpu.pipeline_mode<synchronous>, transform_indices = @transform_2, window_bounds = array<i64: 1, 128>}, {transform_indices = @transform_3, window_bounds = array<i64: 512, 128>}]} {
    %c0_i32 = arith.constant 0 : i32
    %0 = arith.cmpi eq, %arg1, %c0_i32 : i32
    %1 = arith.extui %0 : i1 to i32
    %c0_i32_0 = arith.constant 0 : i32
    %2 = arith.cmpi ne, %1, %c0_i32_0 : i32
    scf.if %2 {
      %cst_10 = arith.constant 0.000000e+00 : f32
      %12 = vector.broadcast %cst_10 : f32 to vector<512x128xf32>
      %c0_11 = arith.constant 0 : index
      %c0_12 = arith.constant 0 : index
      %13 = vector.load %arg6[%c0_11, %c0_12] : memref<512x128xf32, #tpu.memory_space<vmem>>, vector<512x128xf32>
      tpu.vector_store %arg6[%c0_11, %c0_12], %12 {strides = array<i32>} : memref<512x128xf32, #tpu.memory_space<vmem>>, vector<512x128xf32>,
    } else {
    }
    %c0 = arith.constant 0 : index
    %c0_1 = arith.constant 0 : index
    %3 = vector.load %arg6[%c0, %c0_1] : memref<512x128xf32, #tpu.memory_space<vmem>>, vector<512x128xf32>
    %c0_2 = arith.constant 0 : index
    %c0_3 = arith.constant 0 : index
    %4 = vector.load %arg2[%c0_2, %c0_3] : memref<512x256xbf16, #tpu.memory_space<vmem>>, vector<512x256xbf16>
    %c0_4 = arith.constant 0 : index
    %c0_5 = arith.constant 0 : index
    %5 = vector.load %arg3[%c0_4, %c0_5] : memref<256x128xbf16, #tpu.memory_space<vmem>>, vector<256x128xbf16>
    %cst = arith.constant dense<0.000000e+00> : vector<512x128xf32>
    %6 = tpu.matmul %4, %5, %cst {dimension_numbers = #tpu.dot_dimension_numbers<[1], [0], [0], [1], [0, 0, 1, 1], [], []>} : vector<512x256xbf16>, vector<256x128xbf16>, vector<512x128xf32> -> vector<512x128xf32>
    %7 = arith.addf %3, %6 : vector<512x128xf32>
    %c0_6 = arith.constant 0 : index
    %c0_7 = arith.constant 0 : index
    %8 = vector.load %arg6[%c0_6, %c0_7] : memref<512x128xf32, #tpu.memory_space<vmem>>, vector<512x128xf32>
    tpu.vector_store %arg6[%c0_6, %c0_7], %7 {strides = array<i32>} : memref<512x128xf32, #tpu.memory_space<vmem>>, vector<512x128xf32>,
    %c0_i32_8 = arith.constant 0 : i32
    %9 = arith.cmpi eq, %arg1, %c0_i32_8 : i32
    %10 = arith.extui %9 : i1 to i32
    %c0_i32_9 = arith.constant 0 : i32
    %11 = arith.cmpi ne, %10, %c0_i32_9 : i32
    scf.if %11 {
      %c0_10 = arith.constant 0 : index
      %c0_11 = arith.constant 0 : index
      %12 = vector.load %arg6[%c0_10, %c0_11] : memref<512x128xf32, #tpu.memory_space<vmem>>, vector<512x128xf32>
      %c0_12 = arith.constant 0 : index
      %c0_13 = arith.constant 0 : index
      %13 = vector.load %arg4[%c0_12, %c0_13] : memref<1x128xf32, #tpu.memory_space<vmem>>, vector<1x128xf32>
      %14 = vector.broadcast %13 : vector<1x128xf32> to vector<512x128xf32>
      %15 = arith.addf %12, %14 : vector<512x128xf32>
      %cst_14 = arith.constant 0.000000e+00 : f32
      %16 = vector.broadcast %cst_14 : f32 to vector<512x128xf32>
      %17 = arith.maximumf %15, %16 : vector<512x128xf32>
      %18 = arith.truncf %17 : vector<512x128xf32> to vector<512x128xbf16>
      %c0_15 = arith.constant 0 : index
      %c0_16 = arith.constant 0 : index
      %19 = vector.load %arg5[%c0_15, %c0_16] : memref<512x128xbf16, #tpu.memory_space<vmem>>, vector<512x128xbf16>
      tpu.vector_store %arg5[%c0_15, %c0_16], %18 {strides = array<i32>} : memref<512x128xbf16, #tpu.memory_space<vmem>>, vector<512x128xbf16>,
    } else {
    }
    return
  }
  func.func @transform_0(%arg0: i32, %arg1: i32) -> (i32, i32) {
    %c0_i32 = arith.constant 0 : i32
    return %arg0, %arg1 : i32, i32
  }
  func.func @transform_1(%arg0: i32, %arg1: i32) -> (i32, i32) {
    %c0_i32 = arith.constant 0 : i32
    %c0_i32_0 = arith.constant 0 : i32
    return %arg1, %c0_i32 : i32, i32
  }
  func.func @transform_2(%arg0: i32, %arg1: i32) -> (i32, i32) {
    %c0_i32 = arith.constant 0 : i32
    %c0_i32_0 = arith.constant 0 : i32
    %c0_i32_1 = arith.constant 0 : i32
    return %c0_i32, %c0_i32_0 : i32, i32
  }
  func.func @transform_3(%arg0: i32, %arg1: i32) -> (i32, i32) {
    %c0_i32 = arith.constant 0 : i32
    %c0_i32_0 = arith.constant 0 : i32
    return %arg0, %c0_i32 : i32, i32
  }
}

</mosaic_0001>

<bundles_post_ra>
// kernel: tpu_custom_call.1
= control target key start
LH: loop header
LB: loop body
LE: loop exit
PB: predicated region body
PF: predicated region fallthrough
CT: control target
= control target key end

     0   :  { %s3051_s0 = inlined_call_operand.hbm [shape: bf16[2048,256], index: 0, kind: input, shape index: {}]   ;;  %s3052_s1 = inlined_call_operand.hbm [shape: bf16[256,128], index: 1, kind: input, shape index: {}]   ;;  %s3053_s2 = inlined_call_operand.vmem [shape: f32[1,128], index: 2, kind: input, shape index: {}]   ;;  %s3054_s3 = inlined_call_operand.hbm [shape: bf16[2048,128], index: 3, kind: output, shape index: {}]  }
   0x1   :  { %3055 = sst [smem:[#allocation12_spill]] %s3052_s1 }
   0x2   :  { %8 = vsyncpa [#allocation4], 0 }
   0x3   :  { %10 = vsyncpa [#allocation4 + $0x1], 0 }
   0x4   :  { %11 = vsyncpa [#allocation7], 0 }
   0x5   :  { %12 = vsyncpa [#allocation5], 0 }
   0x6   :  { %14 = vsyncpa [#allocation5 + $0x1], 0  ;;  %s2669_s12 = smov 0   ;;  %s2671_s13 = smov 0  }
   0x7   :  { %s2673_s14 = smov 0   ;;  %s2675_s15 = smov 0  }
   0x8   :  { %s2677_s16 = smov 0   ;;  %s2679_s17 = smov 0  }
   0x9 LB: > { %s1786_s18 = sadd.s32 4294967295, %s2640_s17   ;;  %s1787_s19 = sadd.s32 4294967294, %s2640_s17   ;;  %s2640_s17 = sphi %s2679_s17, %s20_s17   ;;  %s2636_s16 = sphi %s2677_s16, %s3068_s16   ;;  %s2632_s15 = sphi %s2675_s15, %s3067_s15   ;;  %s2628_s14 = sphi %s2673_s14, %s3066_s14   ;;  %s2624_s13 = sphi %s2671_s13, %s3065_s13   ;;  %s2620_s12 = sphi %s2669_s12, %s3064_s12  }
   0xa   : > { %p54_p0 = scmp.ne.s32.totalorder %s2624_s13, %s2620_s12  ;;  %p2703_p1 = scmp.eq.s32.totalorder %s1786_s18, 0 }
   0xb   : > { %p2707_p2 = scmp.eq.s32.totalorder %s1786_s18, 3  ;;  %p131_p3 = scmp.eq.s32.totalorder %s1787_s19, 3 }
   0xc   : > { %p2713_p4 = por %p2703_p1, %p54_p0  ;;  %p1788_p5 = scmp.ge.s32.totalorder %s2640_s17, 1 }
   0xd   : > { %p2718_p6 = por %p131_p3, %p54_p0  ;;  %p138_p7 = scmp.lt.s32.totalorder %s2640_s17, 5 }
   0xe   : > { %s3060_s1 = sld [smem:[#allocation12_spill]]  ;;  %s2642_s28 = smov [#allocation6]  }
   0xf   : > { %p2726_p8 = pnand %p1788_p5, %p138_p7  ;;  %s154_s29 = sshll.u32 %s2642_s28, 4  ;;  %s155_s29 = int_to_ptr.vmem [resolvable:$true] %s154_s29 }
  0x10   : > { %s2643_s30 = smov 64   ;;  %s2644_s4 = smov 4  }
  0x11   : > { %p2422_p9 = pneg %p2726_p8  ;;  %s32_s5 = sadd.s32 1, %s2636_s16 }
  0x12   : > { %p34_p11 = scmp.ge.s32.totalorder %s32_s5, 4  ;;  %s41_s6 = sadd.s32 1, %s2628_s14 }
  0x13   : > { %p2423_p10 = pnand %p2422_p9, %p2703_p1  ;;  %p48_p12 = scmp.ne.s32.totalorder %s2628_s14, %s2624_s13 }
  0x14   : > { %s152_s26 = sshll.u32 %s3060_s1, 4  ;;  %p49_p13 = scmp.eq.s32.totalorder %s2640_s17, 0  ;;  %s153_s26 = int_to_ptr.hbm [resolvable:$true] %s152_s26 }
  0x15   : > { %2425 = dma.hbm_to_vmem [thread:$0]  (!%p2423_p10), %s153_s26, 2048, %s155_s29, [#allocation7], %s2643_s30, %s2643_s30, %s2644_s4  }
  0x16   : > { %s3070_s5 = smov (%p34_p11, %s32_s5), 0  ;;  %p2741_p0 = por %p49_p13, %p48_p12 }
  0x17   : > { %p2747_p3 = por %p2707_p2, %p48_p12  ;;  %s36_s9 = ssub.s32 %s2636_s16, %s3070_s5 }
  0x18   : > { %p2435_p5 = scmp.lt.s32.totalorder %s2640_s17, 4  ;;  %p39_p7 = scmp.eq.s32.totalorder %s36_s9, 0 }
  0x19   : > { %s171_s10 = sand.u32 1, %s2628_s14   ;;  %s2125_s19 = sshll.u32 %s2636_s16, 9 }
  0x1a   : > { %s1791_s11 = sshll.u32 %s171_s10, 9  ;;  %s183_s26 = scalar_lea.hbm %s3051_s0, %s2125_s19 }
  0x1b   : > { %s2756_s18 = scalar_select %p39_p7, %s2628_s14, %s41_s6  }
  0x1c   : > { %s175_s28 = scalar_lea.vmem [#allocation3], %s1791_s11  ;;  %s184_s21 = sshll.u32 %s183_s26, 4  ;;  %s185_s21 = int_to_ptr.hbm [resolvable:$true] %s184_s21 }
  0x1d   : > { %s186_s29 = sshll.u32 %s175_s28, 4  ;;  %p2427_p2 = pnand %p2435_p5, %p2741_p0  ;;  %s187_s29 = int_to_ptr.vmem [resolvable:$true] %s186_s29 }
  0x1e   : > { %s172_s30 = scalar_lea.sflag [#allocation4], %s171_s10  ;;  %s2645_s4 = smov 128  }
  0x1f   : > { %s2646_s1 = smov 8   ;;  %198 = sbr.rel (%p2726_p8) target bundleno = 464 (0x1d0), region = 32 }
  0x20   : > { %2429 = dma.hbm_to_vmem [thread:$0]  (!%p2427_p2), %s185_s21, 8192, %s187_s29, %s172_s30, %s2645_s4, %s2645_s4, %s2646_s1  }
  0x21   : > { %s2767_s6 = sand.u32 (!%p2726_p8), 1, %s2624_s13  }
  0x22   : > { %s1796_s9 = sshll.u32 (!%p2726_p8), %s2767_s6, 9  ;;  %s201_s11 = scalar_lea.sflag (!%p2726_p8), [#allocation4], %s2767_s6 }
  0x23   : > { %s2771_s19 = scalar_lea.vmem (!%p2726_p8), [#allocation3], %s1796_s9 }
  0x24   : > { %2607 = dma.done.wait (%p2713_p4), %s201_s11, 8192  }
  0x25   : > { %2609 = vsyncadd (%p2713_p4), %s201_s11, 4294959104 }
  0x26   : > { %2611 = dma.done.wait (%p2703_p1), [#allocation7], 2048  }
  0x27   : > { %2613 = vsyncadd (%p2703_p1), [#allocation7], 4294965248  ;;  %v2197_v0 = vld [vmem:[#allocation6 + $0x38] sm:$0xff]  ;;  %v2196_v2 = vld [vmem:[#allocation6 + $0x30] sm:$0xff]  ;;  %s1798_s22 = sshll.u32 %s2767_s6, 8  ;;  %s2206_s7 = sshll.u32 %s2632_s15, 8 }
  0x28   : > { %v2205_v1 = vld [vmem:[#allocation6 + $0x78] sm:$0xff]  ;;  %881 = vmatpush.bf16.msra.mxu0 %v2197_v0  ;;  %2398 = vmatpush.bf16.msra.mxu2 %v2197_v0  ;;  %v2204_v3 = vld [vmem:[#allocation6 + $0x70] sm:$0xff]  ;;  %v2195_v4 = vld [vmem:[#allocation6 + $0x28] sm:$0xff]  ;;  %s2870_s27 = scalar_lea.vmem [#allocation8], %s1798_s22  ;;  %s1686_s25 = scalar_lea.hbm %s3054_s3, %s2206_s7 }
  0x29   : > { %1050 = vmatpush.bf16.msra.mxu1 %v2205_v1  ;;  %2406 = vmatpush.bf16.msra.mxu3 %v2205_v1  ;;  %v2203_v5 = vld [vmem:[#allocation6 + $0x68] sm:$0xff]  ;;  %v2194_v6 = vld [vmem:[#allocation6 + $0x20] sm:$0xff]  ;;  %v2193_v8 = vld [vmem:[#allocation6 + $0x18] sm:$0xff]  ;;  %s1687_s26 = sshll.u32 %s2870_s27, 4  ;;  %s1689_s15 = sshll.u32 %s1686_s25, 4  ;;  %s1688_s26 = int_to_ptr.vmem [resolvable:$true] %s1687_s26  ;;  %s1690_s15 = int_to_ptr.hbm [resolvable:$true] %s1689_s15 }
  0x2a   : > { %v2202_v7 = vld [vmem:[#allocation6 + $0x60] sm:$0xff]  ;;  %v2201_v9 = vld [vmem:[#allocation6 + $0x58] sm:$0xff]  ;;  %v2192_v10 = vld [vmem:[#allocation6 + $0x10] sm:$0xff]  ;;  %s1675_s28 = scalar_lea.sflag [#allocation5], %s2767_s6  ;;  %s2568_s29 = sshra.s32 %s1690_s15, 4  ;;  %s2569_s29 = int_to_ptr.hbm [resolvable:$true] %s2568_s29 }
  0x2b   : > { %v2200_v11 = vld [vmem:[#allocation6 + $0x50] sm:$0xff]  ;;  %v2191_v12 = vld [vmem:[#allocation6 + $0x8] sm:$0xff]  ;;  %v2190_v14 = vld [vmem:[#allocation6] sm:$0xff]  ;;  %s2570_s21 = scalar_lea.hbm %s2569_s29, 256  ;;  %s2574_s9 = scalar_lea.hbm %s3054_s3, 1024 }
  0x2c   : > { %882 = vmatpush.bf16.msra.mxu0 %v2196_v2  ;;  %2399 = vmatpush.bf16.msra.mxu2 %v2196_v2  ;;  %v2199_v13 = vld [vmem:[#allocation6 + $0x48] sm:$0xff]  ;;  %v2198_v15 = vld [vmem:[#allocation6 + $0x40] sm:$0xff]  ;;  %v1809_v28 = vld [vmem:[%s2771_s19 + $0x10] sm:$0xf]  ;;  %p2571_p1 = scmp.ne.s32.totalorder %s2569_s29, %s2570_s21  ;;  %p2575_p9 = scmp.lt.s32.totalorder %s2569_s29, %s3054_s3 }
  0x2d   : > { %1051 = vmatpush.bf16.msra.mxu1 %v2204_v3  ;;  %2407 = vmatpush.bf16.msra.mxu3 %v2204_v3  ;;  %v1801_v16 = vld [vmem:[%s2771_s19] sm:$0xf]  ;;  %v2127_v17 = vld [vmem:[%s2771_s19 + $0x4] sm:$0xf0]  ;;  %v2126_v20 = vld [vmem:[%s2771_s19 + $0x4] sm:$0xf]  ;;  %p2576_p10 = scmp.lt.s32.totalorder %s2574_s9, %s2570_s21 }
  0x2e   : > { %v1929_v18 = vld [vmem:[%s2771_s19 + $0x100] sm:$0xf]  ;;  %v2159_v19 = vld [vmem:[%s2771_s19 + $0x104] sm:$0xf0]  ;;  %v1803_v21 = vld [vmem:[%s2771_s19 + $0x8] sm:$0xf0]  ;;  %v1802_v24 = vor.u32 %v2127_v17, %v1801_v16  ;;  %p2572_p4 = pnand %p2571_p1, %p2747_p3 }
  0x2f   : > { %v2158_v22 = vld [vmem:[%s2771_s19 + $0x104] sm:$0xf]  ;;  %v1931_v23 = vld [vmem:[%s2771_s19 + $0x108] sm:$0xf0]  ;;  %v1930_v25 = vor.u32 %v2159_v19, %v1929_v18  ;;  %v1806_v26 = vor.u32 %v2126_v20, %v1803_v21  ;;  %v2129_v29 = vld [vmem:[%s2771_s19 + $0x14] sm:$0xf0]  ;;  %p2577_p11 = por %p2576_p10, %p2575_p9 }
  0x30   : > { %883 = vmatpush.bf16.msra.mxu0 %v2195_v4  ;;  %2400 = vmatpush.bf16.msra.mxu2 %v2195_v4  ;;  %v1934_v27 = vor.u32 %v2158_v22, %v1931_v23  ;;  %v1937_v30 = vld [vmem:[%s2771_s19 + $0x110] sm:$0xf]  ;;  %v2161_v31 = vld [vmem:[%s2771_s19 + $0x114] sm:$0xf0]  ;;  %v2128_v32 = vld [vmem:[%s2771_s19 + $0x14] sm:$0xf]  ;;  %v1810_v36 = vor.u32 %v2129_v29, %v1809_v28  ;;  %p2573_p8 = pneg %p2572_p4 }
  0x31   : > { %1052 = vmatpush.bf16.msra.mxu1 %v2203_v5  ;;  %2408 = vmatpush.bf16.msra.mxu3 %v2203_v5  ;;  %v1811_v33 = vld [vmem:[%s2771_s19 + $0x18] sm:$0xf0]  ;;  %v2160_v34 = vld [vmem:[%s2771_s19 + $0x114] sm:$0xf]  ;;  %v1938_v37 = vor.u32 %v2161_v31, %v1937_v30  ;;  %v1817_v40 = vld [vmem:[%s2771_s19 + $0x20] sm:$0xf] }
  0x32   : > { %v1939_v35 = vld [vmem:[%s2771_s19 + $0x118] sm:$0xf0]  ;;  %v1814_v38 = vor.u32 %v2128_v32, %v1811_v33  ;;  %v2131_v41 = vld [vmem:[%s2771_s19 + $0x24] sm:$0xf0]  ;;  %v1945_v42 = vld [vmem:[%s2771_s19 + $0x120] sm:$0xf]  ;;  %p2578_p12 = pnand %p2577_p11, %p2573_p8 }
  0x33   : > { %v1942_v39 = vor.u32 %v2160_v34, %v1939_v35  ;;  %v2163_v43 = vld [vmem:[%s2771_s19 + $0x124] sm:$0xf0]  ;;  %v2130_v44 = vld [vmem:[%s2771_s19 + $0x24] sm:$0xf]  ;;  %v1819_v45 = vld [vmem:[%s2771_s19 + $0x28] sm:$0xf0]  ;;  %v1818_v48 = vor.u32 %v2131_v41, %v1817_v40 }
  0x34   : > { %884 = vmatpush.bf16.msra.mxu0 %v2194_v6  ;;  %2401 = vmatpush.bf16.msra.mxu2 %v2194_v6  ;;  %v2162_v46 = vld [vmem:[%s2771_s19 + $0x124] sm:$0xf]  ;;  %v1947_v47 = vld [vmem:[%s2771_s19 + $0x128] sm:$0xf0]  ;;  %v1946_v49 = vor.u32 %v2163_v43, %v1945_v42  ;;  %v1822_v50 = vor.u32 %v2130_v44, %v1819_v45  ;;  %v1825_v52 = vld [vmem:[%s2771_s19 + $0x30] sm:$0xf] }
  0x35   : > { %1053 = vmatpush.bf16.msra.mxu1 %v2202_v7  ;;  %2409 = vmatpush.bf16.msra.mxu3 %v2202_v7  ;;  %v1950_v51 = vor.u32 %v2162_v46, %v1947_v47  ;;  %v2133_v53 = vld [vmem:[%s2771_s19 + $0x34] sm:$0xf0]  ;;  %v1953_v54 = vld [vmem:[%s2771_s19 + $0x130] sm:$0xf]  ;;  %v2132_v56 = vld [vmem:[%s2771_s19 + $0x34] sm:$0xf] }
  0x36   : > { %v2165_v55 = vld [vmem:[%s2771_s19 + $0x134] sm:$0xf0]  ;;  %v1827_v57 = vld [vmem:[%s2771_s19 + $0x38] sm:$0xf0]  ;;  %v2164_v58 = vld [vmem:[%s2771_s19 + $0x134] sm:$0xf]  ;;  %v1826_v60 = vor.u32 %v2133_v53, %v1825_v52 }
  0x37   : > { %v1955_v59 = vld [vmem:[%s2771_s19 + $0x138] sm:$0xf0]  ;;  %v1954_v61 = vor.u32 %v2165_v55, %v1953_v54  ;;  %v1830_v62 = vor.u32 %v2132_v56, %v1827_v57  ;;  %v1833_v0 = vld [vmem:[%s2771_s19 + $0x40] sm:$0xf]  ;;  %v2135_v1 = vld [vmem:[%s2771_s19 + $0x44] sm:$0xf0] }
  0x38   : > { %885 = vmatpush.bf16.msra.mxu0 %v2193_v8  ;;  %2402 = vmatpush.bf16.msra.mxu2 %v2193_v8  ;;  %v1958_v63 = vor.u32 %v2164_v58, %v1955_v59  ;;  %v1961_v2 = vld [vmem:[%s2771_s19 + $0x140] sm:$0xf]  ;;  %v2167_v3 = vld [vmem:[%s2771_s19 + $0x144] sm:$0xf0]  ;;  %v2134_v4 = vld [vmem:[%s2771_s19 + $0x44] sm:$0xf]  ;;  %v1834_v8 = vor.u32 %v2135_v1, %v1833_v0 }
  0x39   : > { %1054 = vmatpush.bf16.msra.mxu1 %v2201_v9  ;;  %2410 = vmatpush.bf16.msra.mxu3 %v2201_v9  ;;  %v1835_v5 = vld [vmem:[%s2771_s19 + $0x48] sm:$0xf0]  ;;  %v2166_v6 = vld [vmem:[%s2771_s19 + $0x144] sm:$0xf]  ;;  %v1962_v9 = vor.u32 %v2167_v3, %v1961_v2  ;;  %v2136_v16 = vld [vmem:[%s2771_s19 + $0x54] sm:$0xf] }
  0x3a   : > { %v1963_v7 = vld [vmem:[%s2771_s19 + $0x148] sm:$0xf0]  ;;  %v1843_v17 = vld [vmem:[%s2771_s19 + $0x58] sm:$0xf0]  ;;  %v2168_v18 = vld [vmem:[%s2771_s19 + $0x154] sm:$0xf] }
  0x3b   : > { %v1971_v19 = vld [vmem:[%s2771_s19 + $0x158] sm:$0xf0]  ;;  %v1846_v22 = vor.u32 %v2136_v16, %v1843_v17  ;;  %v2138_v28 = vld [vmem:[%s2771_s19 + $0x64] sm:$0xf]  ;;  %v1851_v29 = vld [vmem:[%s2771_s19 + $0x68] sm:$0xf0] }
  0x3c   : > { %886 = vmatpush.bf16.msra.mxu0 %v2192_v10  ;;  %2403 = vmatpush.bf16.msra.mxu2 %v2192_v10  ;;  %v1838_v10 = vor.u32 %v2134_v4, %v1835_v5  ;;  %v1974_v23 = vor.u32 %v2168_v18, %v1971_v19  ;;  %v2170_v30 = vld [vmem:[%s2771_s19 + $0x164] sm:$0xf]  ;;  %v1979_v31 = vld [vmem:[%s2771_s19 + $0x168] sm:$0xf0]  ;;  %v1854_v34 = vor.u32 %v2138_v28, %v1851_v29  ;;  %v2140_v40 = vld [vmem:[%s2771_s19 + $0x74] sm:$0xf] }
  0x3d   : > { %1055 = vmatpush.bf16.msra.mxu1 %v2200_v11  ;;  %2411 = vmatpush.bf16.msra.mxu3 %v2200_v11  ;;  %v1966_v11 = vor.u32 %v2166_v6, %v1963_v7  ;;  %v1982_v35 = vor.u32 %v2170_v30, %v1979_v31  ;;  %v1859_v41 = vld [vmem:[%s2771_s19 + $0x78] sm:$0xf0]  ;;  %v2172_v42 = vld [vmem:[%s2771_s19 + $0x174] sm:$0xf]  ;;  %v2142_v52 = vld [vmem:[%s2771_s19 + $0x84] sm:$0xf] }
  0x3e   : > { %v1987_v43 = vld [vmem:[%s2771_s19 + $0x178] sm:$0xf0]  ;;  %v1862_v46 = vor.u32 %v2140_v40, %v1859_v41  ;;  %v1867_v53 = vld [vmem:[%s2771_s19 + $0x88] sm:$0xf0]  ;;  %v2174_v54 = vld [vmem:[%s2771_s19 + $0x184] sm:$0xf] }
  0x3f   : > { %v1990_v47 = vor.u32 %v2172_v42, %v1987_v43  ;;  %v1995_v55 = vld [vmem:[%s2771_s19 + $0x188] sm:$0xf0]  ;;  %v1870_v59 = vor.u32 %v2142_v52, %v1867_v53  ;;  %v1873_v6 = vld [vmem:[%s2771_s19 + $0x90] sm:$0xf]  ;;  %v2145_v7 = vld [vmem:[%s2771_s19 + $0x94] sm:$0xf0] }
  0x40   : > { %887 = vmatpush.bf16.msra.mxu0 %v2191_v12  ;;  %2404 = vmatpush.bf16.msra.mxu2 %v2191_v12  ;;  %v1841_v12 = vld [vmem:[%s2771_s19 + $0x50] sm:$0xf]  ;;  %v1881_v40 = vld [vmem:[%s2771_s19 + $0xa0] sm:$0xf]  ;;  %v2147_v41 = vld [vmem:[%s2771_s19 + $0xa4] sm:$0xf0] }
  0x41   : > { %1056 = vmatpush.bf16.msra.mxu1 %v2199_v13  ;;  %2412 = vmatpush.bf16.msra.mxu3 %v2199_v13  ;;  %v2137_v13 = vld [vmem:[%s2771_s19 + $0x54] sm:$0xf0]  ;;  %v2009_v42 = vld [vmem:[%s2771_s19 + $0x1a0] sm:$0xf] }
  0x42   : > { %v1842_v20 = vor.u32 %v2137_v13, %v1841_v12  ;;  %v2144_v12 = vld [vmem:[%s2771_s19 + $0x94] sm:$0xf]  ;;  %v1875_v13 = vld [vmem:[%s2771_s19 + $0x98] sm:$0xf0] }
  0x44   : > { %888 = vmatpush.bf16.msra.mxu0 %v2190_v14  ;;  %2405 = vmatpush.bf16.msra.mxu2 %v2190_v14  ;;  %v1969_v14 = vld [vmem:[%s2771_s19 + $0x150] sm:$0xf] }
  0x45   : > { %1057 = vmatpush.bf16.msra.mxu1 %v2198_v15  ;;  %2413 = vmatpush.bf16.msra.mxu3 %v2198_v15  ;;  %v2169_v15 = vld [vmem:[%s2771_s19 + $0x154] sm:$0xf0] }
  0x46   : > { %v1970_v21 = vor.u32 %v2169_v15, %v1969_v14  ;;  %v2176_v14 = vld [vmem:[%s2771_s19 + $0x194] sm:$0xf]  ;;  %v2003_v15 = vld [vmem:[%s2771_s19 + $0x198] sm:$0xf0] }
  0x47   : > { %889 = vmatmul.bf16.vlgmr.msra.gmra.mxu0 %v1802_v24  ;;  %969 = vmatmul.bf16.vlgmr.msra.gmra.mxu2 %v1930_v25  ;;  %v1849_v24 = vld [vmem:[%s2771_s19 + $0x60] sm:$0xf]  ;;  %v2139_v25 = vld [vmem:[%s2771_s19 + $0x64] sm:$0xf0] }
  0x48   : > { %1058 = vmatmul.bf16.vlgmr.msra.gmra.mxu1 %v1806_v26  ;;  %1138 = vmatmul.bf16.vlgmr.msra.gmra.mxu3 %v1934_v27  ;;  %v1977_v26 = vld [vmem:[%s2771_s19 + $0x160] sm:$0xf]  ;;  %v2171_v27 = vld [vmem:[%s2771_s19 + $0x164] sm:$0xf0]  ;;  %v1850_v32 = vor.u32 %v2139_v25, %v1849_v24 }
  0x49   : > { %v1978_v33 = vor.u32 %v2171_v27, %v1977_v26  ;;  %v2006_v27 = vor.u32 %v2176_v14, %v2003_v15 }
  0x57   : > { %894 = vmatmul.bf16.gmra.mxu0 %v1810_v36  ;;  %974 = vmatmul.bf16.gmra.mxu2 %v1938_v37  ;;  %v1857_v36 = vld [vmem:[%s2771_s19 + $0x70] sm:$0xf]  ;;  %v2141_v37 = vld [vmem:[%s2771_s19 + $0x74] sm:$0xf0] }
  0x58   : > { %1063 = vmatmul.bf16.gmra.mxu1 %v1814_v38  ;;  %1143 = vmatmul.bf16.gmra.mxu3 %v1942_v39  ;;  %v1985_v38 = vld [vmem:[%s2771_s19 + $0x170] sm:$0xf]  ;;  %v2173_v39 = vld [vmem:[%s2771_s19 + $0x174] sm:$0xf0]  ;;  %v1858_v44 = vor.u32 %v2141_v37, %v1857_v36 }
  0x59   : > { %v1986_v45 = vor.u32 %v2173_v39, %v1985_v38 }
  0x67   : > { %899 = vmatmul.bf16.gmra.mxu0 %v1818_v48  ;;  %979 = vmatmul.bf16.gmra.mxu2 %v1946_v49  ;;  %v1865_v48 = vld [vmem:[%s2771_s19 + $0x80] sm:$0xf]  ;;  %v2143_v49 = vld [vmem:[%s2771_s19 + $0x84] sm:$0xf0] }
  0x68   : > { %1068 = vmatmul.bf16.gmra.mxu1 %v1822_v50  ;;  %1148 = vmatmul.bf16.gmra.mxu3 %v1950_v51  ;;  %v1993_v50 = vld [vmem:[%s2771_s19 + $0x180] sm:$0xf]  ;;  %v2175_v51 = vld [vmem:[%s2771_s19 + $0x184] sm:$0xf0]  ;;  %v1866_v56 = vor.u32 %v2143_v49, %v1865_v48  ;;  %v2178_v48 = vld [vmem:[%s2771_s19 + $0x1a4] sm:$0xf] }
  0x69   : > { %v1994_v57 = vor.u32 %v2175_v51, %v1993_v50  ;;  %v2011_v49 = vld [vmem:[%s2771_s19 + $0x1a8] sm:$0xf0] }
  0x77   : > { %904 = vmatmul.bf16.gmra.mxu0 %v1826_v60  ;;  %984 = vmatmul.bf16.gmra.mxu2 %v1954_v61  ;;  %v1998_v60 = vor.u32 %v2174_v54, %v1995_v55  ;;  %v1882_v54 = vor.u32 %v2147_v41, %v1881_v40 }
  0x78   : > { %1073 = vmatmul.bf16.gmra.mxu1 %v1830_v62  ;;  %1153 = vmatmul.bf16.gmra.mxu3 %v1958_v63  ;;  %v2856_v63 = vld [vmem:[%s3053_s2] ss:$0 sm:$0xff] }
  0x87   : > { %909 = vmatmul.bf16.gmra.mxu0 %v1834_v8  ;;  %989 = vmatmul.bf16.gmra.mxu2 %v1962_v9  ;;  %v2001_v8 = vld [vmem:[%s2771_s19 + $0x190] sm:$0xf] }
  0x88   : > { %1078 = vmatmul.bf16.gmra.mxu1 %v1838_v10  ;;  %1158 = vmatmul.bf16.gmra.mxu3 %v1966_v11  ;;  %v2177_v11 = vld [vmem:[%s2771_s19 + $0x194] sm:$0xf0] }
  0x97   : > { %914 = vmatmul.bf16.gmra.mxu0 %v1842_v20  ;;  %994 = vmatmul.bf16.gmra.mxu2 %v1970_v21  ;;  %v1874_v20 = vor.u32 %v2145_v7, %v1873_v6  ;;  %v2002_v21 = vor.u32 %v2177_v11, %v2001_v8  ;;  %v1889_v11 = vld [vmem:[%s2771_s19 + $0xb0] sm:$0xf] }
  0x98   : > { %1083 = vmatmul.bf16.gmra.mxu1 %v1846_v22  ;;  %1163 = vmatmul.bf16.gmra.mxu3 %v1974_v23  ;;  %v1878_v22 = vor.u32 %v2144_v12, %v1875_v13  ;;  %v2149_v12 = vld [vmem:[%s2771_s19 + $0xb4] sm:$0xf0]  ;;  %v2017_v13 = vld [vmem:[%s2771_s19 + $0x1b0] sm:$0xf] }
  0xa7   : > { %919 = vmatmul.bf16.gmra.mxu0 %v1850_v32  ;;  %999 = vmatmul.bf16.gmra.mxu2 %v1978_v33 }
  0xa8   : > { %1088 = vmatmul.bf16.gmra.mxu1 %v1854_v34  ;;  %1168 = vmatmul.bf16.gmra.mxu3 %v1982_v35 }
  0xb7   : > { %924 = vmatmul.bf16.gmra.mxu0 %v1858_v44  ;;  %1004 = vmatmul.bf16.gmra.mxu2 %v1986_v45  ;;  %v2179_v45 = vld [vmem:[%s2771_s19 + $0x1a4] sm:$0xf0] }
  0xb8   : > { %1093 = vmatmul.bf16.gmra.mxu1 %v1862_v46  ;;  %1173 = vmatmul.bf16.gmra.mxu3 %v1990_v47  ;;  %v2146_v46 = vld [vmem:[%s2771_s19 + $0xa4] sm:$0xf]  ;;  %v1883_v47 = vld [vmem:[%s2771_s19 + $0xa8] sm:$0xf0]  ;;  %v2010_v55 = vor.u32 %v2179_v45, %v2009_v42  ;;  %v1897_v45 = vld [vmem:[%s2771_s19 + $0xc0] sm:$0xf] }
  0xc4   : > { %v890_v58 = vpop.f32.mrf.mxu0 }
  0xc5   : > { %v1059_v61 = vpop.f32.mrf.mxu1 }
  0xc6   : > { %v1060_v62 = vadd.f32 %v1059_v61, %v890_v58  ;;  %v2014_v61 = vor.u32 %v2178_v48, %v2011_v49 }
  0xc7   : > { %929 = vmatmul.bf16.gmra.mxu0 %v1866_v56  ;;  %1009 = vmatmul.bf16.gmra.mxu2 %v1994_v57  ;;  %v1886_v56 = vor.u32 %v2146_v46, %v1883_v47  ;;  %v2151_v46 = vld [vmem:[%s2771_s19 + $0xc4] sm:$0xf0]  ;;  %v2025_v47 = vld [vmem:[%s2771_s19 + $0x1c0] sm:$0xf] }
  0xc8   : > { %1098 = vmatmul.bf16.gmra.mxu1 %v1870_v59  ;;  %1178 = vmatmul.bf16.gmra.mxu3 %v1998_v60  ;;  %v1418_v4 = vadd.f32 %v2856_v63, %v1060_v62 }
  0xca   : > { %v970_v0 = vpop.f32.mrf.mxu2  ;;  %v1482_v16 = vmax.f32 %v1418_v4, 0.0 }
  0xcb   : > { %v1139_v1 = vpop.f32.mrf.mxu3 }
  0xcc   : > { %v892_v2 = vpop.f32.mrf.mxu0  ;;  %v1140_v9 = vadd.f32 %v1139_v1, %v970_v0 }
  0xcd   : > { %v1061_v3 = vpop.f32.mrf.mxu1 }
  0xce   : > { %v1062_v5 = vadd.f32 %v1061_v3, %v892_v2  ;;  %v1450_v23 = vadd.f32 %v2856_v63, %v1140_v9 }
  0xd0   : > { %v1419_v10 = vadd.f32 %v2856_v63, %v1062_v5  ;;  %v1514_v30 = vmax.f32 %v1450_v23, 0.0 }
  0xd2   : > { %v1483_v17 = vmax.f32 %v1419_v10, 0.0  ;;  %v972_v18 = vpop.f32.mrf.mxu2 }
  0xd3   : > { %v1141_v19 = vpop.f32.mrf.mxu3 }
  0xd4   : > { %v2210_v24 = vpack.c.bf16 %v1483_v17, %v1482_v16  ;;  %v1142_v25 = vadd.f32 %v1141_v19, %v972_v18  ;;  %v895_v26 = vpop.f32.mrf.mxu0  ;;  %v2181_v16 = vld [vmem:[%s2771_s19 + $0x1b4] sm:$0xf0]  ;;  %v2148_v17 = vld [vmem:[%s2771_s19 + $0xb4] sm:$0xf]  ;;  %v1891_v18 = vld [vmem:[%s2771_s19 + $0xb8] sm:$0xf0] }
  0xd5   : > { %v1064_v28 = vpop.f32.mrf.mxu1  ;;  %v2180_v19 = vld [vmem:[%s2771_s19 + $0x1b4] sm:$0xf] }
  0xd6   : > { %2211 = vst [vmem:[%s2870_s27] sm:$0xff] %v2210_v24   ;;  %v1451_v29 = vadd.f32 %v2856_v63, %v1142_v25  ;;  %v1065_v33 = vadd.f32 %v1064_v28, %v895_v26  ;;  %v1890_v25 = vor.u32 %v2149_v12, %v1889_v11  ;;  %v2018_v26 = vor.u32 %v2181_v16, %v2017_v13  ;;  %v1905_v16 = vld [vmem:[%s2771_s19 + $0xd0] sm:$0xf] }
  0xd7   : > { %934 = vmatmul.bf16.gmra.mxu0 %v1874_v20  ;;  %1014 = vmatmul.bf16.gmra.mxu2 %v2002_v21  ;;  %v2019_v20 = vld [vmem:[%s2771_s19 + $0x1b8] sm:$0xf0] }
  0xd8   : > { %v1515_v31 = vmax.f32 %v1451_v29, 0.0  ;;  %1103 = vmatmul.bf16.gmra.mxu1 %v1878_v22  ;;  %1183 = vmatmul.bf16.gmra.mxu3 %v2006_v27  ;;  %v1420_v38 = vadd.f32 %v2856_v63, %v1065_v33  ;;  %v1894_v27 = vor.u32 %v2148_v17, %v1891_v18  ;;  %v2153_v17 = vld [vmem:[%s2771_s19 + $0xd4] sm:$0xf0]  ;;  %v2033_v18 = vld [vmem:[%s2771_s19 + $0x1d0] sm:$0xf] }
  0xda   : > { %v2290_v32 = vpack.c.bf16 %v1515_v31, %v1514_v30  ;;  %v975_v34 = vpop.f32.mrf.mxu2  ;;  %v1484_v50 = vmax.f32 %v1420_v38, 0.0 }
  0xdb   : > { %v1144_v35 = vpop.f32.mrf.mxu3 }
  0xdc   : > { %2382 = vst [vmem:[%s2870_s27 + $0x80] sm:$0xff] %v2290_v32   ;;  %v897_v36 = vpop.f32.mrf.mxu0  ;;  %v1145_v43 = vadd.f32 %v1144_v35, %v975_v34  ;;  %v2022_v32 = vor.u32 %v2180_v19, %v2019_v20 }
  0xdd   : > { %v1066_v37 = vpop.f32.mrf.mxu1 }
  0xde   : > { %v1067_v39 = vadd.f32 %v1066_v37, %v897_v36  ;;  %v1452_v57 = vadd.f32 %v2856_v63, %v1145_v43 }
  0xe0   : > { %v1421_v44 = vadd.f32 %v2856_v63, %v1067_v39  ;;  %v1516_v1 = vmax.f32 %v1452_v57, 0.0 }
  0xe2   : > { %v1485_v51 = vmax.f32 %v1421_v44, 0.0  ;;  %v977_v52 = vpop.f32.mrf.mxu2 }
  0xe3   : > { %v1146_v53 = vpop.f32.mrf.mxu3 }
  0xe4   : > { %v2215_v58 = vpack.c.bf16 %v1485_v51, %v1484_v50  ;;  %v1147_v59 = vadd.f32 %v1146_v53, %v977_v52  ;;  %v900_v60 = vpop.f32.mrf.mxu0  ;;  %v2183_v50 = vld [vmem:[%s2771_s19 + $0x1c4] sm:$0xf0]  ;;  %v2150_v51 = vld [vmem:[%s2771_s19 + $0xc4] sm:$0xf]  ;;  %v1899_v52 = vld [vmem:[%s2771_s19 + $0xc8] sm:$0xf0] }
  0xe5   : > { %v1069_v62 = vpop.f32.mrf.mxu1  ;;  %v2182_v53 = vld [vmem:[%s2771_s19 + $0x1c4] sm:$0xf] }
  0xe6   : > { %2367 = vst [vmem:[%s2870_s27 + $0x8] sm:$0xff] %v2215_v58   ;;  %v1453_v0 = vadd.f32 %v2856_v63, %v1147_v59  ;;  %v1070_v4 = vadd.f32 %v1069_v62, %v900_v60  ;;  %v1898_v59 = vor.u32 %v2151_v46, %v1897_v45  ;;  %v2026_v60 = vor.u32 %v2183_v50, %v2025_v47  ;;  %v1913_v50 = vld [vmem:[%s2771_s19 + $0xe0] sm:$0xf] }
  0xe7   : > { %939 = vmatmul.bf16.gmra.mxu0 %v1882_v54  ;;  %1019 = vmatmul.bf16.gmra.mxu2 %v2010_v55  ;;  %v2027_v54 = vld [vmem:[%s2771_s19 + $0x1c8] sm:$0xf0] }
  0xe8   : > { %v1517_v2 = vmax.f32 %v1453_v0, 0.0  ;;  %1108 = vmatmul.bf16.gmra.mxu1 %v1886_v56  ;;  %1188 = vmatmul.bf16.gmra.mxu3 %v2014_v61  ;;  %v1422_v9 = vadd.f32 %v2856_v63, %v1070_v4  ;;  %v1902_v61 = vor.u32 %v2150_v51, %v1899_v52  ;;  %v2155_v51 = vld [vmem:[%s2771_s19 + $0xe4] sm:$0xf0]  ;;  %v2041_v52 = vld [vmem:[%s2771_s19 + $0x1e0] sm:$0xf] }
  0xea   : > { %v2295_v3 = vpack.c.bf16 %v1517_v2, %v1516_v1  ;;  %v980_v5 = vpop.f32.mrf.mxu2  ;;  %v1486_v21 = vmax.f32 %v1422_v9, 0.0 }
  0xeb   : > { %v1149_v6 = vpop.f32.mrf.mxu3 }
  0xec   : > { %2383 = vst [vmem:[%s2870_s27 + $0x88] sm:$0xff] %v2295_v3   ;;  %v902_v7 = vpop.f32.mrf.mxu0  ;;  %v1150_v14 = vadd.f32 %v1149_v6, %v980_v5  ;;  %v2030_v3 = vor.u32 %v2182_v53, %v2027_v54 }
  0xed   : > { %v1071_v8 = vpop.f32.mrf.mxu1 }
  0xee   : > { %v1072_v10 = vadd.f32 %v1071_v8, %v902_v7  ;;  %v1454_v28 = vadd.f32 %v2856_v63, %v1150_v14 }
  0xf0   : > { %v1423_v15 = vadd.f32 %v2856_v63, %v1072_v10  ;;  %v1518_v35 = vmax.f32 %v1454_v28, 0.0 }
  0xf2   : > { %v1487_v22 = vmax.f32 %v1423_v15, 0.0  ;;  %v982_v23 = vpop.f32.mrf.mxu2 }
  0xf3   : > { %v1151_v24 = vpop.f32.mrf.mxu3 }
  0xf4   : > { %v2220_v29 = vpack.c.bf16 %v1487_v22, %v1486_v21  ;;  %v1152_v30 = vadd.f32 %v1151_v24, %v982_v23  ;;  %v905_v31 = vpop.f32.mrf.mxu0  ;;  %v2185_v21 = vld [vmem:[%s2771_s19 + $0x1d4] sm:$0xf0]  ;;  %v2152_v22 = vld [vmem:[%s2771_s19 + $0xd4] sm:$0xf]  ;;  %v1907_v23 = vld [vmem:[%s2771_s19 + $0xd8] sm:$0xf0] }
  0xf5   : > { %v1074_v33 = vpop.f32.mrf.mxu1  ;;  %v2184_v24 = vld [vmem:[%s2771_s19 + $0x1d4] sm:$0xf] }
  0xf6   : > { %2368 = vst [vmem:[%s2870_s27 + $0x10] sm:$0xff] %v2220_v29   ;;  %v1455_v34 = vadd.f32 %v2856_v63, %v1152_v30  ;;  %v1075_v38 = vadd.f32 %v1074_v33, %v905_v31  ;;  %v1906_v30 = vor.u32 %v2153_v17, %v1905_v16  ;;  %v2034_v31 = vor.u32 %v2185_v21, %v2033_v18  ;;  %v1921_v21 = vld [vmem:[%s2771_s19 + $0xf0] sm:$0xf] }
  0xf7   : > { %944 = vmatmul.bf16.gmra.mxu0 %v1890_v25  ;;  %1024 = vmatmul.bf16.gmra.mxu2 %v2018_v26  ;;  %v2035_v25 = vld [vmem:[%s2771_s19 + $0x1d8] sm:$0xf0] }
  0xf8   : > { %v1519_v36 = vmax.f32 %v1455_v34, 0.0  ;;  %1113 = vmatmul.bf16.gmra.mxu1 %v1894_v27  ;;  %1193 = vmatmul.bf16.gmra.mxu3 %v2022_v32  ;;  %v1424_v43 = vadd.f32 %v2856_v63, %v1075_v38  ;;  %v1910_v32 = vor.u32 %v2152_v22, %v1907_v23  ;;  %v2157_v22 = vld [vmem:[%s2771_s19 + $0xf4] sm:$0xf0]  ;;  %v2049_v23 = vld [vmem:[%s2771_s19 + $0x1f0] sm:$0xf] }
  0xfa   : > { %v2300_v37 = vpack.c.bf16 %v1519_v36, %v1518_v35  ;;  %v985_v39 = vpop.f32.mrf.mxu2  ;;  %v1488_v55 = vmax.f32 %v1424_v43, 0.0 }
  0xfb   : > { %v1154_v40 = vpop.f32.mrf.mxu3 }
  0xfc   : > { %2384 = vst [vmem:[%s2870_s27 + $0x90] sm:$0xff] %v2300_v37   ;;  %v907_v41 = vpop.f32.mrf.mxu0  ;;  %v1155_v48 = vadd.f32 %v1154_v40, %v985_v39  ;;  %v2038_v37 = vor.u32 %v2184_v24, %v2035_v25 }
  0xfd   : > { %v1076_v42 = vpop.f32.mrf.mxu1 }
  0xfe   : > { %v1077_v44 = vadd.f32 %v1076_v42, %v907_v41  ;;  %v1456_v62 = vadd.f32 %v2856_v63, %v1155_v48 }
 0x100   : > { %v1425_v49 = vadd.f32 %v2856_v63, %v1077_v44  ;;  %v1520_v6 = vmax.f32 %v1456_v62, 0.0 }
 0x102   : > { %v1489_v56 = vmax.f32 %v1425_v49, 0.0  ;;  %v987_v57 = vpop.f32.mrf.mxu2 }
 0x103   : > { %v1156_v58 = vpop.f32.mrf.mxu3 }
 0x104   : > { %v2225_v0 = vpack.c.bf16 %v1489_v56, %v1488_v55  ;;  %v1157_v1 = vadd.f32 %v1156_v58, %v987_v57  ;;  %v910_v2 = vpop.f32.mrf.mxu0  ;;  %v2187_v55 = vld [vmem:[%s2771_s19 + $0x1e4] sm:$0xf0]  ;;  %v2154_v56 = vld [vmem:[%s2771_s19 + $0xe4] sm:$0xf]  ;;  %v1915_v57 = vld [vmem:[%s2771_s19 + $0xe8] sm:$0xf0] }
 0x105   : > { %v1079_v4 = vpop.f32.mrf.mxu1  ;;  %v2186_v58 = vld [vmem:[%s2771_s19 + $0x1e4] sm:$0xf] }
 0x106   : > { %2369 = vst [vmem:[%s2870_s27 + $0x18] sm:$0xff] %v2225_v0   ;;  %v1457_v5 = vadd.f32 %v2856_v63, %v1157_v1  ;;  %v1080_v9 = vadd.f32 %v1079_v4, %v910_v2  ;;  %v1914_v1 = vor.u32 %v2155_v51, %v1913_v50  ;;  %v2042_v2 = vor.u32 %v2187_v55, %v2041_v52 }
 0x107   : > { %949 = vmatmul.bf16.gmra.mxu0 %v1898_v59  ;;  %1029 = vmatmul.bf16.gmra.mxu2 %v2026_v60  ;;  %v2043_v59 = vld [vmem:[%s2771_s19 + $0x1e8] sm:$0xf0] }
 0x108   : > { %v1521_v7 = vmax.f32 %v1457_v5, 0.0  ;;  %1118 = vmatmul.bf16.gmra.mxu1 %v1902_v61  ;;  %1198 = vmatmul.bf16.gmra.mxu3 %v2030_v3  ;;  %v1426_v14 = vadd.f32 %v2856_v63, %v1080_v9  ;;  %v1918_v3 = vor.u32 %v2154_v56, %v1915_v57 }
 0x10a   : > { %v2305_v8 = vpack.c.bf16 %v1521_v7, %v1520_v6  ;;  %v990_v10 = vpop.f32.mrf.mxu2  ;;  %v1490_v26 = vmax.f32 %v1426_v14, 0.0 }
 0x10b   : > { %v1159_v11 = vpop.f32.mrf.mxu3 }
 0x10c   : > { %2385 = vst [vmem:[%s2870_s27 + $0x98] sm:$0xff] %v2305_v8   ;;  %v912_v12 = vpop.f32.mrf.mxu0  ;;  %v1160_v19 = vadd.f32 %v1159_v11, %v990_v10  ;;  %v2046_v8 = vor.u32 %v2186_v58, %v2043_v59 }
 0x10d   : > { %v1081_v13 = vpop.f32.mrf.mxu1 }
 0x10e   : > { %v1082_v15 = vadd.f32 %v1081_v13, %v912_v12  ;;  %v1458_v33 = vadd.f32 %v2856_v63, %v1160_v19 }
 0x110   : > { %v1427_v20 = vadd.f32 %v2856_v63, %v1082_v15  ;;  %v1522_v40 = vmax.f32 %v1458_v33, 0.0 }
 0x112   : > { %v1491_v27 = vmax.f32 %v1427_v20, 0.0  ;;  %v992_v28 = vpop.f32.mrf.mxu2 }
 0x113   : > { %v1161_v29 = vpop.f32.mrf.mxu3 }
 0x114   : > { %v2230_v34 = vpack.c.bf16 %v1491_v27, %v1490_v26  ;;  %v1162_v35 = vadd.f32 %v1161_v29, %v992_v28  ;;  %v915_v36 = vpop.f32.mrf.mxu0  ;;  %v2189_v26 = vld [vmem:[%s2771_s19 + $0x1f4] sm:$0xf0]  ;;  %v2156_v27 = vld [vmem:[%s2771_s19 + $0xf4] sm:$0xf]  ;;  %v1923_v28 = vld [vmem:[%s2771_s19 + $0xf8] sm:$0xf0] }
 0x115   : > { %v1084_v38 = vpop.f32.mrf.mxu1  ;;  %v2188_v29 = vld [vmem:[%s2771_s19 + $0x1f4] sm:$0xf] }
 0x116   : > { %2370 = vst [vmem:[%s2870_s27 + $0x20] sm:$0xff] %v2230_v34   ;;  %v1459_v39 = vadd.f32 %v2856_v63, %v1162_v35  ;;  %v1085_v43 = vadd.f32 %v1084_v38, %v915_v36  ;;  %v1922_v35 = vor.u32 %v2157_v22, %v1921_v21  ;;  %v2050_v36 = vor.u32 %v2189_v26, %v2049_v23 }
 0x117   : > { %954 = vmatmul.bf16.gmra.mxu0 %v1906_v30  ;;  %1034 = vmatmul.bf16.gmra.mxu2 %v2034_v31  ;;  %v2051_v30 = vld [vmem:[%s2771_s19 + $0x1f8] sm:$0xf0] }
 0x118   : > { %v1523_v41 = vmax.f32 %v1459_v39, 0.0  ;;  %1123 = vmatmul.bf16.gmra.mxu1 %v1910_v32  ;;  %1203 = vmatmul.bf16.gmra.mxu3 %v2038_v37  ;;  %v1428_v48 = vadd.f32 %v2856_v63, %v1085_v43  ;;  %v1926_v37 = vor.u32 %v2156_v27, %v1923_v28 }
 0x11a   : > { %v2310_v42 = vpack.c.bf16 %v1523_v41, %v1522_v40  ;;  %v995_v44 = vpop.f32.mrf.mxu2  ;;  %v1492_v60 = vmax.f32 %v1428_v48, 0.0 }
 0x11b   : > { %v1164_v45 = vpop.f32.mrf.mxu3 }
 0x11c   : > { %2386 = vst [vmem:[%s2870_s27 + $0xa0] sm:$0xff] %v2310_v42   ;;  %v917_v46 = vpop.f32.mrf.mxu0  ;;  %v1165_v53 = vadd.f32 %v1164_v45, %v995_v44  ;;  %v2054_v42 = vor.u32 %v2188_v29, %v2051_v30 }
 0x11d   : > { %v1086_v47 = vpop.f32.mrf.mxu1 }
 0x11e   : > { %v1087_v49 = vadd.f32 %v1086_v47, %v917_v46  ;;  %v1460_v4 = vadd.f32 %v2856_v63, %v1165_v53 }
 0x120   : > { %v1429_v54 = vadd.f32 %v2856_v63, %v1087_v49  ;;  %v1524_v11 = vmax.f32 %v1460_v4, 0.0 }
 0x122   : > { %v1493_v61 = vmax.f32 %v1429_v54, 0.0  ;;  %v997_v62 = vpop.f32.mrf.mxu2 }
 0x123   : > { %v1166_v0 = vpop.f32.mrf.mxu3 }
 0x124   : > { %v2235_v5 = vpack.c.bf16 %v1493_v61, %v1492_v60  ;;  %v1167_v6 = vadd.f32 %v1166_v0, %v997_v62  ;;  %v920_v7 = vpop.f32.mrf.mxu0 }
 0x125   : > { %v1089_v9 = vpop.f32.mrf.mxu1 }
 0x126   : > { %2371 = vst [vmem:[%s2870_s27 + $0x28] sm:$0xff] %v2235_v5   ;;  %v1461_v10 = vadd.f32 %v2856_v63, %v1167_v6  ;;  %v1090_v14 = vadd.f32 %v1089_v9, %v920_v7 }
 0x127   : > { %959 = vmatmul.bf16.gmra.mxu0 %v1914_v1  ;;  %1039 = vmatmul.bf16.gmra.mxu2 %v2042_v2 }
 0x128   : > { %v1525_v12 = vmax.f32 %v1461_v10, 0.0  ;;  %1128 = vmatmul.bf16.gmra.mxu1 %v1918_v3  ;;  %1208 = vmatmul.bf16.gmra.mxu3 %v2046_v8  ;;  %v1430_v19 = vadd.f32 %v2856_v63, %v1090_v14 }
 0x12a   : > { %v2315_v13 = vpack.c.bf16 %v1525_v12, %v1524_v11  ;;  %v1000_v15 = vpop.f32.mrf.mxu2  ;;  %v1494_v31 = vmax.f32 %v1430_v19, 0.0 }
 0x12b   : > { %v1169_v16 = vpop.f32.mrf.mxu3 }
 0x12c   : > { %2387 = vst [vmem:[%s2870_s27 + $0xa8] sm:$0xff] %v2315_v13   ;;  %v922_v17 = vpop.f32.mrf.mxu0  ;;  %v1170_v24 = vadd.f32 %v1169_v16, %v1000_v15 }
 0x12d   : > { %v1091_v18 = vpop.f32.mrf.mxu1 }
 0x12e   : > { %v1092_v20 = vadd.f32 %v1091_v18, %v922_v17  ;;  %v1462_v38 = vadd.f32 %v2856_v63, %v1170_v24 }
 0x130   : > { %v1431_v25 = vadd.f32 %v2856_v63, %v1092_v20  ;;  %v1526_v45 = vmax.f32 %v1462_v38, 0.0 }
 0x132   : > { %v1495_v32 = vmax.f32 %v1431_v25, 0.0  ;;  %v1002_v33 = vpop.f32.mrf.mxu2 }
 0x133   : > { %v1171_v34 = vpop.f32.mrf.mxu3 }
 0x134   : > { %v2240_v39 = vpack.c.bf16 %v1495_v32, %v1494_v31  ;;  %v1172_v40 = vadd.f32 %v1171_v34, %v1002_v33  ;;  %v925_v41 = vpop.f32.mrf.mxu0 }
 0x135   : > { %v1094_v43 = vpop.f32.mrf.mxu1 }
 0x136   : > { %2372 = vst [vmem:[%s2870_s27 + $0x30] sm:$0xff] %v2240_v39   ;;  %v1463_v44 = vadd.f32 %v2856_v63, %v1172_v40  ;;  %v1095_v48 = vadd.f32 %v1094_v43, %v925_v41 }
 0x137   : > { %964 = vmatmul.bf16.gmra.mxu0 %v1922_v35  ;;  %1044 = vmatmul.bf16.gmra.mxu2 %v2050_v36 }
 0x138   : > { %v1527_v46 = vmax.f32 %v1463_v44, 0.0  ;;  %1133 = vmatmul.bf16.gmra.mxu1 %v1926_v37  ;;  %1213 = vmatmul.bf16.gmra.mxu3 %v2054_v42  ;;  %v1432_v53 = vadd.f32 %v2856_v63, %v1095_v48 }
 0x13a   : > { %v2320_v47 = vpack.c.bf16 %v1527_v46, %v1526_v45  ;;  %v1005_v49 = vpop.f32.mrf.mxu2  ;;  %v1496_v57 = vmax.f32 %v1432_v53, 0.0 }
 0x13b   : > { %v1174_v50 = vpop.f32.mrf.mxu3 }
 0x13c   : > { %2388 = vst [vmem:[%s2870_s27 + $0xb0] sm:$0xff] %v2320_v47   ;;  %v927_v51 = vpop.f32.mrf.mxu0  ;;  %v1175_v55 = vadd.f32 %v1174_v50, %v1005_v49 }
 0x13d   : > { %v1096_v52 = vpop.f32.mrf.mxu1 }
 0x13e   : > { %v1097_v54 = vadd.f32 %v1096_v52, %v927_v51  ;;  %v1464_v61 = vadd.f32 %v2856_v63, %v1175_v55 }
 0x140   : > { %v1433_v56 = vadd.f32 %v2856_v63, %v1097_v54  ;;  %v1528_v4 = vmax.f32 %v1464_v61, 0.0 }
 0x142   : > { %v1497_v58 = vmax.f32 %v1433_v56, 0.0  ;;  %v1007_v59 = vpop.f32.mrf.mxu2 }
 0x143   : > { %v1176_v60 = vpop.f32.mrf.mxu3 }
 0x144   : > { %v2245_v62 = vpack.c.bf16 %v1497_v58, %v1496_v57  ;;  %v1177_v0 = vadd.f32 %v1176_v60, %v1007_v59  ;;  %v930_v1 = vpop.f32.mrf.mxu0 }
 0x145   : > { %v1099_v2 = vpop.f32.mrf.mxu1 }
 0x146   : > { %2373 = vst [vmem:[%s2870_s27 + $0x38] sm:$0xff] %v2245_v62   ;;  %v1465_v3 = vadd.f32 %v2856_v63, %v1177_v0  ;;  %v1100_v7 = vadd.f32 %v1099_v2, %v930_v1 }
 0x148   : > { %v1529_v5 = vmax.f32 %v1465_v3, 0.0  ;;  %v1434_v12 = vadd.f32 %v2856_v63, %v1100_v7 }
 0x14a   : > { %v2325_v6 = vpack.c.bf16 %v1529_v5, %v1528_v4  ;;  %v1010_v8 = vpop.f32.mrf.mxu2  ;;  %v1498_v16 = vmax.f32 %v1434_v12, 0.0 }
 0x14b   : > { %v1179_v9 = vpop.f32.mrf.mxu3 }
 0x14c   : > { %2389 = vst [vmem:[%s2870_s27 + $0xb8] sm:$0xff] %v2325_v6   ;;  %v932_v10 = vpop.f32.mrf.mxu0  ;;  %v1180_v14 = vadd.f32 %v1179_v9, %v1010_v8 }
 0x14d   : > { %v1101_v11 = vpop.f32.mrf.mxu1 }
 0x14e   : > { %v1102_v13 = vadd.f32 %v1101_v11, %v932_v10  ;;  %v1466_v20 = vadd.f32 %v2856_v63, %v1180_v14 }
 0x150   : > { %v1435_v15 = vadd.f32 %v2856_v63, %v1102_v13  ;;  %v1530_v26 = vmax.f32 %v1466_v20, 0.0 }
 0x152   : > { %v1499_v17 = vmax.f32 %v1435_v15, 0.0  ;;  %v1012_v18 = vpop.f32.mrf.mxu2 }
 0x153   : > { %v1181_v19 = vpop.f32.mrf.mxu3 }
 0x154   : > { %v2250_v21 = vpack.c.bf16 %v1499_v17, %v1498_v16  ;;  %v1182_v22 = vadd.f32 %v1181_v19, %v1012_v18  ;;  %v935_v23 = vpop.f32.mrf.mxu0 }
 0x155   : > { %v1104_v24 = vpop.f32.mrf.mxu1 }
 0x156   : > { %2374 = vst [vmem:[%s2870_s27 + $0x40] sm:$0xff] %v2250_v21   ;;  %v1467_v25 = vadd.f32 %v2856_v63, %v1182_v22  ;;  %v1105_v29 = vadd.f32 %v1104_v24, %v935_v23 }
 0x158   : > { %v1531_v27 = vmax.f32 %v1467_v25, 0.0  ;;  %v1436_v34 = vadd.f32 %v2856_v63, %v1105_v29 }
 0x15a   : > { %v2330_v28 = vpack.c.bf16 %v1531_v27, %v1530_v26  ;;  %v1015_v30 = vpop.f32.mrf.mxu2  ;;  %v1500_v38 = vmax.f32 %v1436_v34, 0.0 }
 0x15b   : > { %v1184_v31 = vpop.f32.mrf.mxu3 }
 0x15c   : > { %2390 = vst [vmem:[%s2870_s27 + $0xc0] sm:$0xff] %v2330_v28   ;;  %v937_v32 = vpop.f32.mrf.mxu0  ;;  %v1185_v36 = vadd.f32 %v1184_v31, %v1015_v30 }
 0x15d   : > { %v1106_v33 = vpop.f32.mrf.mxu1 }
 0x15e   : > { %v1107_v35 = vadd.f32 %v1106_v33, %v937_v32  ;;  %v1468_v42 = vadd.f32 %v2856_v63, %v1185_v36 }
 0x160   : > { %v1437_v37 = vadd.f32 %v2856_v63, %v1107_v35  ;;  %v1532_v48 = vmax.f32 %v1468_v42, 0.0 }
 0x162   : > { %v1501_v39 = vmax.f32 %v1437_v37, 0.0  ;;  %v1017_v40 = vpop.f32.mrf.mxu2 }
 0x163   : > { %v1186_v41 = vpop.f32.mrf.mxu3 }
 0x164   : > { %v2255_v43 = vpack.c.bf16 %v1501_v39, %v1500_v38  ;;  %v1187_v44 = vadd.f32 %v1186_v41, %v1017_v40  ;;  %v940_v45 = vpop.f32.mrf.mxu0 }
 0x165   : > { %v1109_v46 = vpop.f32.mrf.mxu1 }
 0x166   : > { %2375 = vst [vmem:[%s2870_s27 + $0x48] sm:$0xff] %v2255_v43   ;;  %v1469_v47 = vadd.f32 %v2856_v63, %v1187_v44  ;;  %v1110_v51 = vadd.f32 %v1109_v46, %v940_v45 }
 0x168   : > { %v1533_v49 = vmax.f32 %v1469_v47, 0.0  ;;  %v1438_v56 = vadd.f32 %v2856_v63, %v1110_v51 }
 0x16a   : > { %v2335_v50 = vpack.c.bf16 %v1533_v49, %v1532_v48  ;;  %v1020_v52 = vpop.f32.mrf.mxu2  ;;  %v1502_v60 = vmax.f32 %v1438_v56, 0.0 }
 0x16b   : > { %v1189_v53 = vpop.f32.mrf.mxu3 }
 0x16c   : > { %2391 = vst [vmem:[%s2870_s27 + $0xc8] sm:$0xff] %v2335_v50   ;;  %v942_v54 = vpop.f32.mrf.mxu0  ;;  %v1190_v58 = vadd.f32 %v1189_v53, %v1020_v52 }
 0x16d   : > { %v1111_v55 = vpop.f32.mrf.mxu1 }
 0x16e   : > { %v1112_v57 = vadd.f32 %v1111_v55, %v942_v54  ;;  %v1470_v1 = vadd.f32 %v2856_v63, %v1190_v58 }
 0x170   : > { %v1439_v59 = vadd.f32 %v2856_v63, %v1112_v57  ;;  %v1534_v7 = vmax.f32 %v1470_v1, 0.0 }
 0x172   : > { %v1503_v61 = vmax.f32 %v1439_v59, 0.0  ;;  %v1022_v62 = vpop.f32.mrf.mxu2 }
 0x173   : > { %v1191_v0 = vpop.f32.mrf.mxu3 }
 0x174   : > { %v2260_v2 = vpack.c.bf16 %v1503_v61, %v1502_v60  ;;  %v1192_v3 = vadd.f32 %v1191_v0, %v1022_v62  ;;  %v945_v4 = vpop.f32.mrf.mxu0 }
 0x175   : > { %v1114_v5 = vpop.f32.mrf.mxu1 }
 0x176   : > { %2376 = vst [vmem:[%s2870_s27 + $0x50] sm:$0xff] %v2260_v2   ;;  %v1471_v6 = vadd.f32 %v2856_v63, %v1192_v3  ;;  %v1115_v10 = vadd.f32 %v1114_v5, %v945_v4 }
 0x178   : > { %v1535_v8 = vmax.f32 %v1471_v6, 0.0  ;;  %v1440_v15 = vadd.f32 %v2856_v63, %v1115_v10 }
 0x17a   : > { %v2340_v9 = vpack.c.bf16 %v1535_v8, %v1534_v7  ;;  %v1025_v11 = vpop.f32.mrf.mxu2  ;;  %v1504_v19 = vmax.f32 %v1440_v15, 0.0 }
 0x17b   : > { %v1194_v12 = vpop.f32.mrf.mxu3 }
 0x17c   : > { %2392 = vst [vmem:[%s2870_s27 + $0xd0] sm:$0xff] %v2340_v9   ;;  %v947_v13 = vpop.f32.mrf.mxu0  ;;  %v1195_v17 = vadd.f32 %v1194_v12, %v1025_v11 }
 0x17d   : > { %v1116_v14 = vpop.f32.mrf.mxu1 }
 0x17e   : > { %v1117_v16 = vadd.f32 %v1116_v14, %v947_v13  ;;  %v1472_v23 = vadd.f32 %v2856_v63, %v1195_v17 }
 0x180   : > { %v1441_v18 = vadd.f32 %v2856_v63, %v1117_v16  ;;  %v1536_v29 = vmax.f32 %v1472_v23, 0.0 }
 0x182   : > { %v1505_v20 = vmax.f32 %v1441_v18, 0.0  ;;  %v1027_v21 = vpop.f32.mrf.mxu2 }
 0x183   : > { %v1196_v22 = vpop.f32.mrf.mxu3 }
 0x184   : > { %v2265_v24 = vpack.c.bf16 %v1505_v20, %v1504_v19  ;;  %v1197_v25 = vadd.f32 %v1196_v22, %v1027_v21  ;;  %v950_v26 = vpop.f32.mrf.mxu0 }
 0x185   : > { %v1119_v27 = vpop.f32.mrf.mxu1 }
 0x186   : > { %2377 = vst [vmem:[%s2870_s27 + $0x58] sm:$0xff] %v2265_v24   ;;  %v1473_v28 = vadd.f32 %v2856_v63, %v1197_v25  ;;  %v1120_v32 = vadd.f32 %v1119_v27, %v950_v26 }
 0x188   : > { %v1537_v30 = vmax.f32 %v1473_v28, 0.0  ;;  %v1442_v37 = vadd.f32 %v2856_v63, %v1120_v32 }
 0x18a   : > { %v2345_v31 = vpack.c.bf16 %v1537_v30, %v1536_v29  ;;  %v1030_v33 = vpop.f32.mrf.mxu2  ;;  %v1506_v41 = vmax.f32 %v1442_v37, 0.0 }
 0x18b   : > { %v1199_v34 = vpop.f32.mrf.mxu3 }
 0x18c   : > { %2393 = vst [vmem:[%s2870_s27 + $0xd8] sm:$0xff] %v2345_v31   ;;  %v952_v35 = vpop.f32.mrf.mxu0  ;;  %v1200_v39 = vadd.f32 %v1199_v34, %v1030_v33 }
 0x18d   : > { %v1121_v36 = vpop.f32.mrf.mxu1 }
 0x18e   : > { %v1122_v38 = vadd.f32 %v1121_v36, %v952_v35  ;;  %v1474_v45 = vadd.f32 %v2856_v63, %v1200_v39 }
 0x190   : > { %v1443_v40 = vadd.f32 %v2856_v63, %v1122_v38  ;;  %v1538_v51 = vmax.f32 %v1474_v45, 0.0 }
 0x192   : > { %v1507_v42 = vmax.f32 %v1443_v40, 0.0  ;;  %v1032_v43 = vpop.f32.mrf.mxu2 }
 0x193   : > { %v1201_v44 = vpop.f32.mrf.mxu3 }
 0x194   : > { %v2270_v46 = vpack.c.bf16 %v1507_v42, %v1506_v41  ;;  %v1202_v47 = vadd.f32 %v1201_v44, %v1032_v43  ;;  %v955_v48 = vpop.f32.mrf.mxu0 }
 0x195   : > { %v1124_v49 = vpop.f32.mrf.mxu1 }
 0x196   : > { %2378 = vst [vmem:[%s2870_s27 + $0x60] sm:$0xff] %v2270_v46   ;;  %v1475_v50 = vadd.f32 %v2856_v63, %v1202_v47  ;;  %v1125_v54 = vadd.f32 %v1124_v49, %v955_v48 }
 0x198   : > { %v1539_v52 = vmax.f32 %v1475_v50, 0.0  ;;  %v1444_v59 = vadd.f32 %v2856_v63, %v1125_v54 }
 0x19a   : > { %v2350_v53 = vpack.c.bf16 %v1539_v52, %v1538_v51  ;;  %v1035_v55 = vpop.f32.mrf.mxu2  ;;  %v1508_v0 = vmax.f32 %v1444_v59, 0.0 }
 0x19b   : > { %v1204_v56 = vpop.f32.mrf.mxu3 }
 0x19c   : > { %2394 = vst [vmem:[%s2870_s27 + $0xe0] sm:$0xff] %v2350_v53   ;;  %v957_v57 = vpop.f32.mrf.mxu0  ;;  %v1205_v61 = vadd.f32 %v1204_v56, %v1035_v55 }
 0x19d   : > { %v1126_v58 = vpop.f32.mrf.mxu1 }
 0x19e   : > { %v1127_v60 = vadd.f32 %v1126_v58, %v957_v57  ;;  %v1476_v4 = vadd.f32 %v2856_v63, %v1205_v61 }
 0x1a0   : > { %v1445_v62 = vadd.f32 %v2856_v63, %v1127_v60  ;;  %v1540_v10 = vmax.f32 %v1476_v4, 0.0 }
 0x1a2   : > { %v1509_v1 = vmax.f32 %v1445_v62, 0.0  ;;  %v1037_v2 = vpop.f32.mrf.mxu2 }
 0x1a3   : > { %v1206_v3 = vpop.f32.mrf.mxu3 }
 0x1a4   : > { %v2275_v5 = vpack.c.bf16 %v1509_v1, %v1508_v0  ;;  %v1207_v6 = vadd.f32 %v1206_v3, %v1037_v2  ;;  %v960_v7 = vpop.f32.mrf.mxu0 }
 0x1a5   : > { %v1129_v8 = vpop.f32.mrf.mxu1 }
 0x1a6   : > { %2379 = vst [vmem:[%s2870_s27 + $0x68] sm:$0xff] %v2275_v5   ;;  %v1477_v9 = vadd.f32 %v2856_v63, %v1207_v6  ;;  %v1130_v13 = vadd.f32 %v1129_v8, %v960_v7 }
 0x1a8   : > { %v1541_v11 = vmax.f32 %v1477_v9, 0.0  ;;  %v1446_v18 = vadd.f32 %v2856_v63, %v1130_v13 }
 0x1aa   : > { %v2355_v12 = vpack.c.bf16 %v1541_v11, %v1540_v10  ;;  %v1040_v14 = vpop.f32.mrf.mxu2  ;;  %v1510_v22 = vmax.f32 %v1446_v18, 0.0 }
 0x1ab   : > { %v1209_v15 = vpop.f32.mrf.mxu3 }
 0x1ac   : > { %2395 = vst [vmem:[%s2870_s27 + $0xe8] sm:$0xff] %v2355_v12   ;;  %v962_v16 = vpop.f32.mrf.mxu0  ;;  %v1210_v20 = vadd.f32 %v1209_v15, %v1040_v14 }
 0x1ad   : > { %v1131_v17 = vpop.f32.mrf.mxu1 }
 0x1ae   : > { %v1132_v19 = vadd.f32 %v1131_v17, %v962_v16  ;;  %v1478_v26 = vadd.f32 %v2856_v63, %v1210_v20 }
 0x1b0   : > { %v1447_v21 = vadd.f32 %v2856_v63, %v1132_v19  ;;  %v1542_v32 = vmax.f32 %v1478_v26, 0.0 }
 0x1b2   : > { %v1511_v23 = vmax.f32 %v1447_v21, 0.0  ;;  %v1042_v24 = vpop.f32.mrf.mxu2 }
 0x1b3   : > { %v1211_v25 = vpop.f32.mrf.mxu3 }
 0x1b4   : > { %v2280_v27 = vpack.c.bf16 %v1511_v23, %v1510_v22  ;;  %v1212_v28 = vadd.f32 %v1211_v25, %v1042_v24  ;;  %v965_v29 = vpop.f32.mrf.mxu0 }
 0x1b5   : > { %v1134_v30 = vpop.f32.mrf.mxu1 }
 0x1b6   : > { %2380 = vst [vmem:[%s2870_s27 + $0x70] sm:$0xff] %v2280_v27   ;;  %v1479_v31 = vadd.f32 %v2856_v63, %v1212_v28  ;;  %v1135_v35 = vadd.f32 %v1134_v30, %v965_v29 }
 0x1b8   : > { %v1543_v33 = vmax.f32 %v1479_v31, 0.0  ;;  %v1448_v40 = vadd.f32 %v2856_v63, %v1135_v35 }
 0x1ba   : > { %v2360_v34 = vpack.c.bf16 %v1543_v33, %v1542_v32  ;;  %v1045_v36 = vpop.f32.mrf.mxu2  ;;  %v1512_v44 = vmax.f32 %v1448_v40, 0.0 }
 0x1bb   : > { %v1214_v37 = vpop.f32.mrf.mxu3 }
 0x1bc   : > { %2396 = vst [vmem:[%s2870_s27 + $0xf0] sm:$0xff] %v2360_v34   ;;  %v967_v38 = vpop.f32.mrf.mxu0  ;;  %v1215_v42 = vadd.f32 %v1214_v37, %v1045_v36 }
 0x1bd   : > { %v1136_v39 = vpop.f32.mrf.mxu1 }
 0x1be   : > { %v1137_v41 = vadd.f32 %v1136_v39, %v967_v38  ;;  %v1480_v48 = vadd.f32 %v2856_v63, %v1215_v42 }
 0x1c0   : > { %v1449_v43 = vadd.f32 %v2856_v63, %v1137_v41  ;;  %v1544_v52 = vmax.f32 %v1480_v48, 0.0 }
 0x1c2   : > { %v1513_v45 = vmax.f32 %v1449_v43, 0.0  ;;  %v1047_v46 = vpop.f32.mrf.mxu2 }
 0x1c3   : > { %v1216_v47 = vpop.f32.mrf.mxu3 }
 0x1c4   : > { %v2285_v49 = vpack.c.bf16 %v1513_v45, %v1512_v44  ;;  %v1217_v50 = vadd.f32 %v1216_v47, %v1047_v46 }
 0x1c6   : > { %2381 = vst [vmem:[%s2870_s27 + $0x78] sm:$0xff] %v2285_v49   ;;  %v1481_v51 = vadd.f32 %v2856_v63, %v1217_v50 }
 0x1c8   : > { %v1545_v53 = vmax.f32 %v1481_v51, 0.0 }
 0x1ca   : > { %v2365_v54 = vpack.c.bf16 %v1545_v53, %v1544_v52 }
 0x1cc   : > { %2397 = vst [vmem:[%s2870_s27 + $0xf8] sm:$0xff] %v2365_v54  }
 0x1cd   : > { %2581 = shalt.err (!%p2578_p12)
}
 0x1ce   : > { %s2647_s6 = smov 64   ;;  %s2648_s1 = smov 4  }
 0x1cf   : > { %2420 = dma.vmem_to_hbm [thread:$0]  (%p2747_p3), %s1688_s26, 4096, %s1690_s15, %s1675_s28, %s2647_s6, %s2647_s6, %s2648_s1  }
 0x1d0 PF: > { %p2437_p13 = scmp.ge.s32.totalorder %s2640_s17, 2  ;;  %s1704_s20 = sand.u32 1, %s2620_s12  }
 0x1d1   : > { %s1705_s22 = scalar_lea.sflag [#allocation5], %s1704_s20 }
 0x1d2   : > { %p2431_p0 = pnand %p2437_p13, %p2718_p6 }
 0x1d4   : > { %p2432_p5 = pneg %p2431_p0 }
 0x1d6   : > { %2615 = dma.done.wait (%p2432_p5), %s1705_s22, 4096  }
 0x1d7   : > { %2617 = vsyncadd (%p2432_p5), %s1705_s22, 4294963200  ;;  %s20_s17 = sadd.s32 1, %s2640_s17   ;;  %s3064_s12 = smov %s2624_s13 }
 0x1d8   : > { %p17_p7 = scmp.ge.s32.totalorder %s20_s17, 6   ;;  %s3065_s13 = smov %s2628_s14 }
 0x1d9   : > { %s3066_s14 = smov %s2756_s18  ;;  %s3067_s15 = smov %s2636_s16 }
 0x1da   : > { %s3068_s16 = smov %s3070_s5  ;;  %19 = sbr.rel (!%p17_p7) target bundleno = 9 (0x9), region = 90 }
 0x1df   :  { %1711 = vsyncpa [#allocation4], 1 }
 0x1e0   :  { %1713 = vsyncpa [#allocation4 + $0x1], 1 }
 0x1e1   :  { %1714 = vsyncpa [#allocation7], 1 }
 0x1e2   :  { %1715 = vsyncpa [#allocation5], 1 }
 0x1e3   :  { %1717 = vsyncpa [#allocation5 + $0x1], 1 }

</bundles_post_ra>
